<compile_context>
chip_gen: v5e
topology: v5e:2x2
jax: 0.10.0
libtpu: 0.0.40
codegen_flags: <defaults>
</compile_context>

<pallas_src>
import functools

import jax
import jax.numpy as jnp
from jax.experimental import pallas as pl
from jax.experimental.pallas import tpu as pltpu

_NEG = -1e30  # "minus infinity" that never produces inf - inf NaNs


def _round_up(x, m):
    return (x + m - 1) // m * m


def _vmem_limit_bytes():
    """Generation-aware scoped-VMEM request: 96 MiB on 128-MiB chips, 48 MiB on v7x."""
    cap = 128 * 1024 * 1024
    try:
        info = pltpu.get_tpu_info()
        cap = int(getattr(info, "vmem_capacity_bytes", cap))
    except Exception:
        pass
    return int(min(cap * 3 // 4, 96 * 1024 * 1024))


def _lm_ce_kernel(logits_ref, tgt_ref, out_ref, m_ref, l_ref, p_ref, *,
                  num_classes, c_tile, mask_tail):
    """One (token-tile, vocab-chunk) grid step of per-token cross entropy."""
    c = pl.program_id(1)
    nc = pl.num_programs(1)

    # Fresh accumulators at the start of every vocab sweep.
    @pl.when(c == 0)
    def _init():
        m_ref[...] = jnp.full(m_ref.shape, _NEG, m_ref.dtype)  # running max
        l_ref[...] = jnp.zeros(l_ref.shape, l_ref.dtype)       # running sum-exp
        p_ref[...] = jnp.zeros(p_ref.shape, p_ref.dtype)       # target logit

    x = logits_ref[...].astype(jnp.float32)                    # (tok, ct) f32
    tok, ct = x.shape

    # (1, ct) row iota + chunk-local targets: one row fill instead of a full
    # (tok, ct) iota + scalar add regenerated on every grid step.
    col_row = jax.lax.broadcasted_iota(jnp.int32, (1, ct), 1)
    tgt_local = tgt_ref[...] - c * c_tile                      # (tok, 1) int32

    def update(xv):
        # Gather the target logit for this chunk (matches in exactly one chunk).
        p_ref[...] += jnp.sum(jnp.where(col_row == tgt_local, xv, 0.0),
                              axis=-1, keepdims=True)
        # Online log-sum-exp update.
        m_prev = m_ref[...]
        m_new = jnp.maximum(m_prev, jnp.max(xv, axis=-1, keepdims=True))
        l_ref[...] = (l_ref[...] * jnp.exp(m_prev - m_new)
                      + jnp.sum(jnp.exp(xv - m_new), axis=-1, keepdims=True))
        m_ref[...] = m_new

    if mask_tail:
        # Ragged vocab tail: pay the masking VALU cost ONLY on the last chunk.
        @pl.when(c < nc - 1)
        def _full_chunk():
            update(x)

        @pl.when(c == nc - 1)
        def _tail_chunk():
            valid = num_classes - c * c_tile                   # scalar
            update(jnp.where(col_row < valid, x, _NEG))
    else:
        update(x)

    # Finalize: ce = logsumexp(x) - x[target], emitted as a (tok, 1) column.
    # The output is O(B*S) total, so the narrow store is negligible and we
    # avoid any O(tok^2) work or sublane->lane relayout in-kernel.
    @pl.when(c == nc - 1)
    def _finalize():
        out_ref[...] = (m_ref[...] + jnp.log(l_ref[...])) - p_ref[...]


def lm_loss(logits, target, masks=None, sample_weight=None, reduction="mean",
            *, tok_tile=256, c_tile=None):
    """Pallas implementation of unitorch LMLoss.forward."""
    assert logits.ndim == 3 and target.ndim == 2
    B, S, C = logits.shape
    N = B * S

    x = logits.reshape(N, C)                  # keep native dtype (bf16 ok)
    tgt = target.reshape(N, 1).astype(jnp.int32)

    vmem_limit = _vmem_limit_bytes()
    itemsize = x.dtype.itemsize

    # --- token tile ---------------------------------------------------------
    # Multiple of 128 (lane-sublane friendly); shrink for tiny inputs.
    tok_tile = max(128, min(_round_up(tok_tile, 128), _round_up(N, 128)))
    if N > 128:
        # Guarantee >= 2 tiles on the "parallel" axis so both v7x TensorCores
        # get work even for small batches (no-op for large N).
        tok_tile = min(tok_tile, max(128, _round_up(-(-N // 2), 128)))
    n_pad = _round_up(N, tok_tile)
    if n_pad != N:
        x = jnp.pad(x, ((0, n_pad - N), (0, 0)))
        tgt = jnp.pad(tgt, ((0, n_pad - N), (0, 0)))
    n_tok_tiles = n_pad // tok_tile

    # --- vocab chunk (dtype- and generation-aware) ---------------------------
    if c_tile is None:
        if itemsize <= 2:
            c_tile = 8192                     # bf16: same block bytes as 4096@f32
        else:
            c_tile = 8192 if vmem_limit >= 64 * 1024 * 1024 else 4096
    if C <= c_tile:
        c_tile_eff = C                        # single exact chunk, no ragged tail
    else:
        c_tile_eff = _round_up(min(c_tile, C), 128)
        # Keep double-buffered logits blocks + f32 compute temporaries well
        # under the scoped-VMEM limit (matters on v7x's 64 MiB).
        budget = int(vmem_limit * 0.6)
        per_col = tok_tile * (2 * itemsize + 2 * 4)
        max_c = max(128, (budget // per_col) // 128 * 128)
        c_tile_eff = min(c_tile_eff, max_c)
    n_c_tiles = -(-C // c_tile_eff)
    mask_tail = (C % c_tile_eff) != 0

    kernel = functools.partial(_lm_ce_kernel, num_classes=C,
                               c_tile=c_tile_eff, mask_tail=mask_tail)

    bytes_accessed = (n_pad * C * itemsize    # logits read (native dtype)
                      + n_pad * 4             # targets read
                      + n_pad * 4)            # per-token CE write

    ce_col = pl.pallas_call(
        kernel,
        out_shape=jax.ShapeDtypeStruct((n_pad, 1), jnp.float32),
        grid=(n_tok_tiles, n_c_tiles),
        in_specs=[
            pl.BlockSpec((tok_tile, c_tile_eff), lambda t, c: (t, c)),
            pl.BlockSpec((tok_tile, 1), lambda t, c: (t, 0)),
        ],
        out_specs=pl.BlockSpec((tok_tile, 1), lambda t, c: (t, 0)),
        scratch_shapes=[
            pltpu.VMEM((tok_tile, 1), jnp.float32),   # running max
            pltpu.VMEM((tok_tile, 1), jnp.float32),   # running sum-exp
            pltpu.VMEM((tok_tile, 1), jnp.float32),   # picked target logit
        ],
        compiler_params=pltpu.CompilerParams(
            dimension_semantics=("parallel", "arbitrary"),
            vmem_limit_bytes=vmem_limit,
        ),
        cost_estimate=pl.CostEstimate(
            flops=int(5 * n_pad * C),
            transcendentals=int(n_pad * C),
            bytes_accessed=int(bytes_accessed),
        ),
    )(x, tgt)

    # --- cheap O(B*S) glue; matches the PyTorch module exactly ---------------
    ce_tok = ce_col.reshape(-1)[:N]                            # (B*S,) f32
    if masks is None:
        m = jnp.ones((B, S), jnp.float32)
    else:
        m = masks.reshape(B, S).astype(jnp.float32)
    ce = ce_tok.reshape(B, S) * m
    loss = jnp.sum(ce, axis=1) / jnp.maximum(jnp.sum(m, axis=1), 1.0)
    if sample_weight is not None:
        loss = loss * sample_weight.reshape(B).astype(jnp.float32)
    if reduction == "mean":
        loss = jnp.mean(loss)
    return loss


def _lm_loss_ref(logits, target, masks=None, sample_weight=None, reduction="mean"):
    """Pure-JAX reference mirroring the PyTorch module."""
    B, S, C = logits.shape
    lg = logits.astype(jnp.float32)
    tgt = target.astype(jnp.int32)
    if masks is None:
        masks = jnp.ones((B, S), jnp.float32)
    m = masks.reshape(B, S).astype(jnp.float32)
    logprobs = jax.nn.log_softmax(lg, axis=-1)
    ce = -jnp.take_along_axis(logprobs, tgt[..., None], axis=-1)[..., 0]
    ce = ce * m
    loss = jnp.sum(ce, axis=1) / jnp.maximum(jnp.sum(m, axis=1), 1.0)
    if sample_weight is not None:
        loss = loss * sample_weight.reshape(B).astype(jnp.float32)
    if reduction == "mean":
        loss = jnp.mean(loss)
    return loss


if __name__ == "__main__":
    key = jax.random.PRNGKey(0)
    k1, k2, k3, k4, k5, k6, k7 = jax.random.split(key, 7)

    # Case A: bf16 logits, multi-chunk vocab sweep (384 = 3 x 128), ragged
    # valid lengths, sample weights, mean reduction.
    B, S, C = 2, 8, 384
    logits = jax.random.normal(k1, (B, S, C), dtype=jnp.float32).astype(jnp.bfloat16)
    target = jax.random.randint(k2, (B, S), 0, C, dtype=jnp.int32)
    lengths = jnp.array([8, 5], dtype=jnp.int32)
    masks = (jnp.arange(S)[None, :] < lengths[:, None]).astype(jnp.float32)
    sample_weight = jax.random.uniform(k3, (B,), dtype=jnp.float32) + 0.5

    ref_a = _lm_loss_ref(logits, target, masks, sample_weight, reduction="mean")
    out_a = jax.block_until_ready(
        lm_loss(logits, target, masks, sample_weight, reduction="mean",
                tok_tile=128, c_tile=128))
    assert jnp.allclose(out_a, ref_a, rtol=1e-4, atol=1e-4), (out_a, ref_a)

    # Same inputs through the default (large-tile, single vocab chunk) path.
    out_a2 = jax.block_until_ready(
        lm_loss(logits, target, masks, sample_weight, reduction="mean"))
    assert jnp.allclose(out_a2, ref_a, rtol=1e-4, atol=1e-4), (out_a2, ref_a)

    # Case B: f32 logits, vocab not a multiple of the chunk (ragged tail masked
    # only on the last chunk), no masks / sample_weight, "none" reduction.
    C2 = 200
    logits2 = jax.random.normal(k4, (B, S, C2), dtype=jnp.float32)
    target2 = jax.random.randint(k5, (B, S), 0, C2, dtype=jnp.int32)
    ref_b = _lm_loss_ref(logits2, target2, None, None, reduction="none")
    out_b = jax.block_until_ready(
        lm_loss(logits2, target2, None, None, reduction="none",
                tok_tile=128, c_tile=128))
    assert jnp.allclose(out_b, ref_b, rtol=1e-4, atol=1e-4), (out_b, ref_b)

    # Case C: same f32 / C=200 inputs through the DEFAULT path (single chunk
    # whose width is NOT a multiple of 128) -- covers the review's correctness
    # concern about that path.
    out_c = jax.block_until_ready(
        lm_loss(logits2, target2, None, None, reduction="none"))
    assert jnp.allclose(out_c, ref_b, rtol=1e-4, atol=1e-4), (out_c, ref_b)

    # Case D: bf16, longer sequence so B*S spans multiple token tiles (the
    # "parallel"/megacore axis), single non-128-multiple vocab chunk, masks.
    B2, S2, C3 = 2, 144, 520
    logits3 = jax.random.normal(k6, (B2, S2, C3), dtype=jnp.float32).astype(jnp.bfloat16)
    target3 = jax.random.randint(k7, (B2, S2), 0, C3, dtype=jnp.int32)
    lengths3 = jnp.array([144, 100], dtype=jnp.int32)
    masks3 = (jnp.arange(S2)[None, :] < lengths3[:, None]).astype(jnp.float32)
    ref_d = _lm_loss_ref(logits3, target3, masks3, None, reduction="mean")
    out_d = jax.block_until_ready(
        lm_loss(logits3, target3, masks3, None, reduction="mean"))
    assert jnp.allclose(out_d, ref_d, rtol=1e-4, atol=1e-4), (out_d, ref_d)

    print("KERNEL_OK")
</pallas_src>

<mosaic_0001>
module attributes {stable_mosaic.version = 11 : i64} {
  func.func @_lm_ce_kernel(%arg0: i32, %arg1: i32, %arg2: memref<128x128xbf16, #tpu.memory_space<vmem>>, %arg3: memref<128x1xi32, #tpu.memory_space<vmem>>, %arg4: memref<128x1xf32, #tpu.memory_space<vmem>>, %arg5: memref<128x1xf32, #tpu.memory_space<vmem>>, %arg6: memref<128x1xf32, #tpu.memory_space<vmem>>, %arg7: memref<128x1xf32, #tpu.memory_space<vmem>>) attributes {dimension_semantics = [#tpu.dimension_semantics<parallel>, #tpu.dimension_semantics<arbitrary>], iteration_bounds = array<i64: 1, 3>, scalar_prefetch = 0 : i64, scratch_operands = 3 : i64, tpu.core_type = #tpu.core_type<tc>, window_params = [{transform_indices = @transform_0, window_bounds = array<i64: 128, 128>}, {transform_indices = @transform_1, window_bounds = array<i64: 128, 1>}, {transform_indices = @transform_2, window_bounds = array<i64: 128, 1>}]} {
    %c0_i32 = arith.constant 0 : i32
    %0 = arith.cmpi eq, %arg1, %c0_i32 : i32
    %1 = arith.extui %0 : i1 to i32
    %c0_i32_0 = arith.constant 0 : i32
    %2 = arith.cmpi ne, %1, %c0_i32_0 : i32
    scf.if %2 {
      %cst_20 = arith.constant -1.000000e+30 : f32
      %39 = vector.broadcast %cst_20 : f32 to vector<128x1xf32>
      %c0_21 = arith.constant 0 : index
      %c0_22 = arith.constant 0 : index
      %40 = vector.load %arg5[%c0_21, %c0_22] : memref<128x1xf32, #tpu.memory_space<vmem>>, vector<128x1xf32>
      tpu.vector_store %arg5[%c0_21, %c0_22], %39 {strides = array<i32>} : memref<128x1xf32, #tpu.memory_space<vmem>>, vector<128x1xf32>,
      %cst_23 = arith.constant 0.000000e+00 : f32
      %41 = vector.broadcast %cst_23 : f32 to vector<128x1xf32>
      %c0_24 = arith.constant 0 : index
      %c0_25 = arith.constant 0 : index
      %42 = vector.load %arg6[%c0_24, %c0_25] : memref<128x1xf32, #tpu.memory_space<vmem>>, vector<128x1xf32>
      tpu.vector_store %arg6[%c0_24, %c0_25], %41 {strides = array<i32>} : memref<128x1xf32, #tpu.memory_space<vmem>>, vector<128x1xf32>,
      %cst_26 = arith.constant 0.000000e+00 : f32
      %43 = vector.broadcast %cst_26 : f32 to vector<128x1xf32>
      %c0_27 = arith.constant 0 : index
      %c0_28 = arith.constant 0 : index
      %44 = vector.load %arg7[%c0_27, %c0_28] : memref<128x1xf32, #tpu.memory_space<vmem>>, vector<128x1xf32>
      tpu.vector_store %arg7[%c0_27, %c0_28], %43 {strides = array<i32>} : memref<128x1xf32, #tpu.memory_space<vmem>>, vector<128x1xf32>,
    } else {
    }
    %c0 = arith.constant 0 : index
    %c0_1 = arith.constant 0 : index
    %3 = vector.load %arg2[%c0, %c0_1] : memref<128x128xbf16, #tpu.memory_space<vmem>>, vector<128x128xbf16>
    %4 = arith.extf %3 : vector<128x128xbf16> to vector<128x128xf32>
    %5 = tpu.iota {dimensions = array<i32: 1>} : vector<1x128xi32>
    %c0_2 = arith.constant 0 : index
    %c0_3 = arith.constant 0 : index
    %6 = vector.load %arg3[%c0_2, %c0_3] : memref<128x1xi32, #tpu.memory_space<vmem>>, vector<128x1xi32>
    %c128_i32 = arith.constant 128 : i32
    %7 = arith.muli %arg1, %c128_i32 : i32
    %8 = vector.broadcast %7 : i32 to vector<128x1xi32>
    %9 = arith.subi %6, %8 : vector<128x1xi32>
    %c0_4 = arith.constant 0 : index
    %c0_5 = arith.constant 0 : index
    %10 = vector.load %arg7[%c0_4, %c0_5] : memref<128x1xf32, #tpu.memory_space<vmem>>, vector<128x1xf32>
    %11 = vector.broadcast %5 : vector<1x128xi32> to vector<128x128xi32>
    %12 = vector.broadcast %9 : vector<128x1xi32> to vector<128x128xi32>
    %13 = arith.cmpi eq, %11, %12 : vector<128x128xi32>
    %cst = arith.constant 0.000000e+00 : f32
    %14 = vector.broadcast %cst : f32 to vector<128x128xf32>
    %15 = arith.select %13, %4, %14 : vector<128x128xi1>, vector<128x128xf32>
    %cst_6 = arith.constant dense<0.000000e+00> : vector<128xf32>
    %16 = vector.multi_reduction <add>, %15, %cst_6 [1] : vector<128x128xf32> to vector<128xf32>
    %17 = vector.shape_cast %16 : vector<128xf32> to vector<128x1xf32>
    %18 = arith.addf %10, %17 : vector<128x1xf32>
    %c0_7 = arith.constant 0 : index
    %c0_8 = arith.constant 0 : index
    %19 = vector.load %arg7[%c0_7, %c0_8] : memref<128x1xf32, #tpu.memory_space<vmem>>, vector<128x1xf32>
    tpu.vector_store %arg7[%c0_7, %c0_8], %18 {strides = array<i32>} : memref<128x1xf32, #tpu.memory_space<vmem>>, vector<128x1xf32>,
    %c0_9 = arith.constant 0 : index
    %c0_10 = arith.constant 0 : index
    %20 = vector.load %arg5[%c0_9, %c0_10] : memref<128x1xf32, #tpu.memory_space<vmem>>, vector<128x1xf32>
    %cst_11 = arith.constant dense<0xFF800000> : vector<128xf32>
    %21 = vector.multi_reduction <maximumf>, %4, %cst_11 [1] : vector<128x128xf32> to vector<128xf32>
    %22 = vector.shape_cast %21 : vector<128xf32> to vector<128x1xf32>
    %23 = arith.maximumf %20, %22 : vector<128x1xf32>
    %c0_12 = arith.constant 0 : index
    %c0_13 = arith.constant 0 : index
    %24 = vector.load %arg6[%c0_12, %c0_13] : memref<128x1xf32, #tpu.memory_space<vmem>>, vector<128x1xf32>
    %25 = arith.subf %20, %23 : vector<128x1xf32>
    %26 = math.exp %25 : vector<128x1xf32>
    %27 = arith.mulf %24, %26 : vector<128x1xf32>
    %28 = vector.broadcast %23 : vector<128x1xf32> to vector<128x128xf32>
    %29 = arith.subf %4, %28 : vector<128x128xf32>
    %30 = math.exp %29 : vector<128x128xf32>
    %cst_14 = arith.constant dense<0.000000e+00> : vector<128xf32>
    %31 = vector.multi_reduction <add>, %30, %cst_14 [1] : vector<128x128xf32> to vector<128xf32>
    %32 = vector.shape_cast %31 : vector<128xf32> to vector<128x1xf32>
    %33 = arith.addf %27, %32 : vector<128x1xf32>
    %c0_15 = arith.constant 0 : index
    %c0_16 = arith.constant 0 : index
    %34 = vector.load %arg6[%c0_15, %c0_16] : memref<128x1xf32, #tpu.memory_space<vmem>>, vector<128x1xf32>
    tpu.vector_store %arg6[%c0_15, %c0_16], %33 {strides = array<i32>} : memref<128x1xf32, #tpu.memory_space<vmem>>, vector<128x1xf32>,
    %c0_17 = arith.constant 0 : index
    %c0_18 = arith.constant 0 : index
    %35 = vector.load %arg5[%c0_17, %c0_18] : memref<128x1xf32, #tpu.memory_space<vmem>>, vector<128x1xf32>
    tpu.vector_store %arg5[%c0_17, %c0_18], %23 {strides = array<i32>} : memref<128x1xf32, #tpu.memory_space<vmem>>, vector<128x1xf32>,
    %c2_i32 = arith.constant 2 : i32
    %36 = arith.cmpi eq, %arg1, %c2_i32 : i32
    %37 = arith.extui %36 : i1 to i32
    %c0_i32_19 = arith.constant 0 : i32
    %38 = arith.cmpi ne, %37, %c0_i32_19 : i32
    scf.if %38 {
      %c0_20 = arith.constant 0 : index
      %c0_21 = arith.constant 0 : index
      %39 = vector.load %arg5[%c0_20, %c0_21] : memref<128x1xf32, #tpu.memory_space<vmem>>, vector<128x1xf32>
      %c0_22 = arith.constant 0 : index
      %c0_23 = arith.constant 0 : index
      %40 = vector.load %arg6[%c0_22, %c0_23] : memref<128x1xf32, #tpu.memory_space<vmem>>, vector<128x1xf32>
      %41 = math.log %40 : vector<128x1xf32>
      %42 = arith.addf %39, %41 : vector<128x1xf32>
      %c0_24 = arith.constant 0 : index
      %c0_25 = arith.constant 0 : index
      %43 = vector.load %arg7[%c0_24, %c0_25] : memref<128x1xf32, #tpu.memory_space<vmem>>, vector<128x1xf32>
      %44 = arith.subf %42, %43 : vector<128x1xf32>
      %c0_26 = arith.constant 0 : index
      %c0_27 = arith.constant 0 : index
      %45 = vector.load %arg4[%c0_26, %c0_27] : memref<128x1xf32, #tpu.memory_space<vmem>>, vector<128x1xf32>
      tpu.vector_store %arg4[%c0_26, %c0_27], %44 {strides = array<i32>} : memref<128x1xf32, #tpu.memory_space<vmem>>, vector<128x1xf32>,
    } else {
    }
    return
  }
  func.func @transform_0(%arg0: i32, %arg1: i32) -> (i32, i32) {
    %c0_i32 = arith.constant 0 : i32
    return %arg0, %arg1 : i32, i32
  }
  func.func @transform_1(%arg0: i32, %arg1: i32) -> (i32, i32) {
    %c0_i32 = arith.constant 0 : i32
    %c0_i32_0 = arith.constant 0 : i32
    return %arg0, %c0_i32 : i32, i32
  }
  func.func @transform_2(%arg0: i32, %arg1: i32) -> (i32, i32) {
    %c0_i32 = arith.constant 0 : i32
    %c0_i32_0 = arith.constant 0 : i32
    return %arg0, %c0_i32 : i32, i32
  }
}

</mosaic_0001>

<bundles_post_ra>
// kernel: tpu_custom_call.1
= control target key start
LH: loop header
LB: loop body
LE: loop exit
PB: predicated region body
PF: predicated region fallthrough
CT: control target
= control target key end

     0   :  { %7 = vsyncpa [#allocation6], 0  ;;  %s1973_s0 = inlined_call_operand.hbm [shape: bf16[128,384], index: 0, kind: input, shape index: {}]   ;;  %s1974_s1 = inlined_call_operand.vmem [shape: s32[128,1], index: 1, kind: input, shape index: {}]   ;;  %s1975_s2 = inlined_call_operand.vmem [shape: f32[128,1], index: 2, kind: output, shape index: {}]  }
   0x1   :  { %9 = vsyncpa [#allocation6 + $0x1], 0  ;;  %s1379_s9 = smov 0   ;;  %s1381_s10 = smov 0  }
   0x2   :  { %s1383_s11 = smov 0   ;;  %s1385_s12 = smov 0  }
   0x3   :  { %s1387_s13 = smov 0   ;;  %s1389_s14 = smov 0  }
   0x4 LB: > { %s1062_s15 = sadd.s32 4294967295, %s1356_s14   ;;  %s24_s16 = sadd.s32 1, %s1352_s13  ;;  %s1356_s14 = sphi %s1389_s14, %s15_s14   ;;  %s1352_s13 = sphi %s1387_s13, %s1996_s13   ;;  %s1348_s12 = sphi %s1385_s12, %s1995_s12   ;;  %s1344_s11 = sphi %s1383_s11, %s1994_s11   ;;  %s1340_s10 = sphi %s1381_s10, %s1993_s10   ;;  %s1336_s9 = sphi %s1379_s9, %s1992_s9  }
   0x5   : > { %p25_p0 = scmp.ge.s32.totalorder %s24_s16, 3  ;;  %s36_s17 = sadd.s32 1, %s1344_s11 }
   0x6   : > { %p43_p1 = scmp.ne.s32.totalorder %s1344_s11, %s1340_s10  ;;  %p44_p2 = scmp.eq.s32.totalorder %s1356_s14, 0 }
   0x7   : > { %s1998_s16 = smov (%p25_p0, %s24_s16), 0  ;;  %p49_p4 = scmp.ne.s32.totalorder %s1340_s10, %s1336_s9 }
   0x8   : > { %p1415_p3 = por %p44_p2, %p43_p1  ;;  %s32_s19 = ssub.s32 %s1352_s13, %s1998_s16 }
   0x9   : > { %p50_p5 = scmp.eq.s32.totalorder %s1062_s15, 0  ;;  %p34_p6 = scmp.eq.s32.totalorder %s32_s19, 0 }
   0xa   : > { %p1122_p8 = scmp.lt.s32.totalorder %s1356_s14, 3  ;;  %s134_s22 = sand.u32 1, %s1344_s11  }
   0xb   : > { %p1422_p7 = por %p50_p5, %p49_p4  ;;  %s1067_s23 = sshll.u32 %s1352_s13, 2 }
   0xc   : > { %s1428_s21 = scalar_select %p34_p6, %s1344_s11, %s36_s17  }
   0xd   : > { %s1066_s24 = sshll.u32 %s134_s22, 6  ;;  %s145_s27 = scalar_lea.hbm %s1973_s0, %s1067_s23 }
   0xe   : > { %s146_s28 = sshll.u32 %s145_s27, 4  ;;  %s138_s29 = scalar_lea.vmem [#allocation5], %s1066_s24  ;;  %s147_s28 = int_to_ptr.hbm [resolvable:$true] %s146_s28 }
   0xf   : > { %s148_s30 = sshll.u32 %s138_s29, 4  ;;  %p1119_p9 = pnand %p1122_p8, %p1415_p3  ;;  %s149_s30 = int_to_ptr.vmem [resolvable:$true] %s148_s30 }
  0x10   : > { %p1068_p10 = scmp.ge.s32.totalorder %s1356_s14, 1  ;;  %s135_s3 = scalar_lea.sflag [#allocation6], %s134_s22 }
  0x11   : > { %s1358_s4 = smov 192   ;;  %s1359_s5 = smov 64  }
  0x12   : > { %s1360_s6 = smov 4   ;;  %p156_p11 = scmp.lt.s32.totalorder %s1356_s14, 4 }
  0x13   : > { %1121 = dma.hbm_to_vmem [thread:$0]  (!%p1119_p9), %s147_s28, 1024, %s149_s30, %s135_s3, %s1358_s4, %s1359_s5, %s1360_s6  }
  0x14   : > { %p157_p12 = pnand %p1068_p10, %p156_p11 }
  0x15   : > { %s162_s7 = sand.u32 (!%p157_p12), 1, %s1340_s10  }
  0x16   : > { %160 = sbr.rel (%p157_p12) target bundleno = 680 (0x2a8), region = 28  ;;  %s1069_s8 = sshll.u32 (!%p157_p12), %s162_s7, 6 }
  0x17   : > { %s163_s9 = scalar_lea.sflag (!%p157_p12), [#allocation6], %s162_s7  ;;  %s1440_s15 = scalar_lea.vmem (!%p157_p12), [#allocation5], %s1069_s8 }
  0x1b   : > { %1331 = dma.done.wait (%p1422_p7), %s163_s9, 1024  }
  0x1c   : > { %1333 = vsyncadd (%p1422_p7), %s163_s9, 4294966272  ;;  %p1070_p13 = scmp.ne.s32.totalorder %s1348_s12, 0 }
  0x1e   : > { %209 = sbr.rel (%p1070_p13) target bundleno = 84 (0x54), region = 36 }
  0x23   : > { %vm210_vm0 = vcmask 7168   ;;  %v1361_v0 = vmov -1e+30   ;;  %v1362_v1 = vmov 0.0  }
  0x24   : > { %211 = vst.msk [vmem:[#allocation2] sm:$0xff] %vm210_vm0, %v1361_v0 }
  0x25   : > { %212 = vst.msk [vmem:[#allocation2 + $0x8] sm:$0xff] %vm210_vm0, %v1361_v0 }
  0x26   : > { %213 = vst.msk [vmem:[#allocation2 + $0x10] sm:$0xff] %vm210_vm0, %v1361_v0 }
  0x27   : > { %214 = vst.msk [vmem:[#allocation2 + $0x18] sm:$0xff] %vm210_vm0, %v1361_v0 }
  0x28   : > { %215 = vst.msk [vmem:[#allocation2 + $0x20] sm:$0xff] %vm210_vm0, %v1361_v0 }
  0x29   : > { %216 = vst.msk [vmem:[#allocation2 + $0x28] sm:$0xff] %vm210_vm0, %v1361_v0 }
  0x2a   : > { %217 = vst.msk [vmem:[#allocation2 + $0x30] sm:$0xff] %vm210_vm0, %v1361_v0 }
  0x2b   : > { %218 = vst.msk [vmem:[#allocation2 + $0x38] sm:$0xff] %vm210_vm0, %v1361_v0 }
  0x2c   : > { %219 = vst.msk [vmem:[#allocation2 + $0x40] sm:$0xff] %vm210_vm0, %v1361_v0 }
  0x2d   : > { %220 = vst.msk [vmem:[#allocation2 + $0x48] sm:$0xff] %vm210_vm0, %v1361_v0 }
  0x2e   : > { %221 = vst.msk [vmem:[#allocation2 + $0x50] sm:$0xff] %vm210_vm0, %v1361_v0 }
  0x2f   : > { %222 = vst.msk [vmem:[#allocation2 + $0x58] sm:$0xff] %vm210_vm0, %v1361_v0 }
  0x30   : > { %223 = vst.msk [vmem:[#allocation2 + $0x60] sm:$0xff] %vm210_vm0, %v1361_v0 }
  0x31   : > { %224 = vst.msk [vmem:[#allocation2 + $0x68] sm:$0xff] %vm210_vm0, %v1361_v0 }
  0x32   : > { %225 = vst.msk [vmem:[#allocation2 + $0x70] sm:$0xff] %vm210_vm0, %v1361_v0 }
  0x33   : > { %226 = vst.msk [vmem:[#allocation2 + $0x78] sm:$0xff] %vm210_vm0, %v1361_v0 }
  0x34   : > { %227 = vst.msk [vmem:[#allocation3] sm:$0xff] %vm210_vm0, %v1362_v1 }
  0x35   : > { %228 = vst.msk [vmem:[#allocation3 + $0x8] sm:$0xff] %vm210_vm0, %v1362_v1 }
  0x36   : > { %229 = vst.msk [vmem:[#allocation3 + $0x10] sm:$0xff] %vm210_vm0, %v1362_v1 }
  0x37   : > { %230 = vst.msk [vmem:[#allocation3 + $0x18] sm:$0xff] %vm210_vm0, %v1362_v1 }
  0x38   : > { %231 = vst.msk [vmem:[#allocation3 + $0x20] sm:$0xff] %vm210_vm0, %v1362_v1 }
  0x39   : > { %232 = vst.msk [vmem:[#allocation3 + $0x28] sm:$0xff] %vm210_vm0, %v1362_v1 }
  0x3a   : > { %233 = vst.msk [vmem:[#allocation3 + $0x30] sm:$0xff] %vm210_vm0, %v1362_v1 }
  0x3b   : > { %234 = vst.msk [vmem:[#allocation3 + $0x38] sm:$0xff] %vm210_vm0, %v1362_v1 }
  0x3c   : > { %235 = vst.msk [vmem:[#allocation3 + $0x40] sm:$0xff] %vm210_vm0, %v1362_v1 }
  0x3d   : > { %236 = vst.msk [vmem:[#allocation3 + $0x48] sm:$0xff] %vm210_vm0, %v1362_v1 }
  0x3e   : > { %237 = vst.msk [vmem:[#allocation3 + $0x50] sm:$0xff] %vm210_vm0, %v1362_v1 }
  0x3f   : > { %238 = vst.msk [vmem:[#allocation3 + $0x58] sm:$0xff] %vm210_vm0, %v1362_v1 }
  0x40   : > { %239 = vst.msk [vmem:[#allocation3 + $0x60] sm:$0xff] %vm210_vm0, %v1362_v1 }
  0x41   : > { %240 = vst.msk [vmem:[#allocation3 + $0x68] sm:$0xff] %vm210_vm0, %v1362_v1 }
  0x42   : > { %241 = vst.msk [vmem:[#allocation3 + $0x70] sm:$0xff] %vm210_vm0, %v1362_v1 }
  0x43   : > { %242 = vst.msk [vmem:[#allocation3 + $0x78] sm:$0xff] %vm210_vm0, %v1362_v1 }
  0x44   : > { %243 = vst.msk [vmem:[#allocation4] sm:$0xff] %vm210_vm0, %v1362_v1 }
  0x45   : > { %244 = vst.msk [vmem:[#allocation4 + $0x8] sm:$0xff] %vm210_vm0, %v1362_v1 }
  0x46   : > { %245 = vst.msk [vmem:[#allocation4 + $0x10] sm:$0xff] %vm210_vm0, %v1362_v1 }
  0x47   : > { %246 = vst.msk [vmem:[#allocation4 + $0x18] sm:$0xff] %vm210_vm0, %v1362_v1 }
  0x48   : > { %247 = vst.msk [vmem:[#allocation4 + $0x20] sm:$0xff] %vm210_vm0, %v1362_v1 }
  0x49   : > { %248 = vst.msk [vmem:[#allocation4 + $0x28] sm:$0xff] %vm210_vm0, %v1362_v1 }
  0x4a   : > { %249 = vst.msk [vmem:[#allocation4 + $0x30] sm:$0xff] %vm210_vm0, %v1362_v1 }
  0x4b   : > { %250 = vst.msk [vmem:[#allocation4 + $0x38] sm:$0xff] %vm210_vm0, %v1362_v1 }
  0x4c   : > { %251 = vst.msk [vmem:[#allocation4 + $0x40] sm:$0xff] %vm210_vm0, %v1362_v1 }
  0x4d   : > { %252 = vst.msk [vmem:[#allocation4 + $0x48] sm:$0xff] %vm210_vm0, %v1362_v1 }
  0x4e   : > { %253 = vst.msk [vmem:[#allocation4 + $0x50] sm:$0xff] %vm210_vm0, %v1362_v1 }
  0x4f   : > { %254 = vst.msk [vmem:[#allocation4 + $0x58] sm:$0xff] %vm210_vm0, %v1362_v1 }
  0x50   : > { %255 = vst.msk [vmem:[#allocation4 + $0x60] sm:$0xff] %vm210_vm0, %v1362_v1 }
  0x51   : > { %256 = vst.msk [vmem:[#allocation4 + $0x68] sm:$0xff] %vm210_vm0, %v1362_v1 }
  0x52   : > { %257 = vst.msk [vmem:[#allocation4 + $0x70] sm:$0xff] %vm210_vm0, %v1362_v1 }
  0x53   : > { %258 = vst.msk [vmem:[#allocation4 + $0x78] sm:$0xff] %vm210_vm0, %v1362_v1 }
  0x54 PF: > { %v295_v2 = vld [vmem:[%s1974_s1 + $0x10] sm:$0xff]  ;;  %s1071_s19 = sshll.u32 %s1348_s12, 7  ;;  %v293_v3 = vld [vmem:[%s1974_s1] sm:$0xff]  ;;  %v1363_v5 = vmov 0   ;;  %v296_v10 = vld [vmem:[%s1974_s1 + $0x18] sm:$0xff]  ;;  %v291_v39 = vlaneseq  ;;  %p1072_p0 = scmp.ne.s32.totalorder %s1348_s12, 2 }
  0x55   : > { %v297_v4 = vld [vmem:[%s1974_s1 + $0x20] sm:$0xff]  ;;  %1178 = vset.pattern.permute.xlu1 %v1363_v5  ;;  %1177 = vset.pattern.permute.xlu0 %v1363_v5  ;;  %v310_v6 = vstv %s1071_s19  ;;  %v294_v11 = vld [vmem:[%s1974_s1 + $0x8] sm:$0xff]  ;;  %v300_v16 = vld [vmem:[%s1974_s1 + $0x38] sm:$0xff] }
  0x56   : > { %v313_v7 = vsub.s32 %v295_v2, %v310_v6  ;;  %v311_v8 = vsub.s32 %v293_v3, %v310_v6  ;;  %1179 = vset.pattern.permute.xlu2 %v1363_v5  ;;  %v315_v9 = vsub.s32 %v297_v4, %v310_v6  ;;  %v298_v12 = vld [vmem:[%s1974_s1 + $0x28] sm:$0xff]  ;;  %v314_v13 = vsub.s32 %v296_v10, %v310_v6  ;;  %v299_v17 = vld [vmem:[%s1974_s1 + $0x30] sm:$0xff]  ;;  %v301_v18 = vld [vmem:[%s1974_s1 + $0x40] sm:$0xff] }
  0x57   : > { %v312_v14 = vsub.s32 %v294_v11, %v310_v6  ;;  %v316_v15 = vsub.s32 %v298_v12, %v310_v6  ;;  %v318_v19 = vsub.s32 %v300_v16, %v310_v6  ;;  %v317_v20 = vsub.s32 %v299_v17, %v310_v6  ;;  %v303_v22 = vld [vmem:[%s1974_s1 + $0x50] sm:$0xff]  ;;  %v302_v23 = vld [vmem:[%s1974_s1 + $0x48] sm:$0xff]  ;;  %v304_v24 = vld [vmem:[%s1974_s1 + $0x58] sm:$0xff] }
  0x58   : > { %350 = vperm.xlu1 %1178, %v313_v7   ;;  %344 = vperm.xlu0 %1177, %v311_v8   ;;  %v319_v21 = vsub.s32 %v301_v18, %v310_v6  ;;  %v321_v25 = vsub.s32 %v303_v22, %v310_v6  ;;  %v320_v26 = vsub.s32 %v302_v23, %v310_v6  ;;  %v306_v28 = vld [vmem:[%s1974_s1 + $0x68] sm:$0xff]  ;;  %v305_v29 = vld [vmem:[%s1974_s1 + $0x60] sm:$0xff]  ;;  %v307_v30 = vld [vmem:[%s1974_s1 + $0x70] sm:$0xff]  ;;  %v1552_v41 = vand.u32 127, %v291_v39 }
  0x59   : > { %356 = vperm.xlu2 %1179, %v315_v9   ;;  %v322_v27 = vsub.s32 %v304_v24, %v310_v6  ;;  %v324_v31 = vsub.s32 %v306_v28, %v310_v6  ;;  %v323_v32 = vsub.s32 %v305_v29, %v310_v6  ;;  %v325_v33 = vsub.s32 %v307_v30, %v310_v6  ;;  %v308_v34 = vld [vmem:[%s1974_s1 + $0x78] sm:$0xff]  ;;  %v1078_v36 = vld [vmem:[%s1440_s15] sm:$0xff]   ;;  %v1109_v40 = vld [vmem:[%s1440_s15 + $0x8] sm:$0xff]  }
  0x5a   : > { %v326_v35 = vsub.s32 %v308_v34, %v310_v6  ;;  %v1545_v37 = vunpack.c.h.bf16 %v1078_v36  ;;  %v1547_v38 = vunpack.c.l.bf16 %v1078_v36  ;;  %v1554_v42 = vunpack.c.l.bf16 %v1109_v40  ;;  %v1110_v45 = vld [vmem:[%s1440_s15 + $0x10] sm:$0xff]   ;;  %v1111_v54 = vld [vmem:[%s1440_s15 + $0x18] sm:$0xff]   ;;  %v1112_v0 = vld [vmem:[%s1440_s15 + $0x20] sm:$0xff]  }
  0x5b   : > { %v1561_v49 = vunpack.c.l.bf16 %v1110_v45  ;;  %v1568_v56 = vunpack.c.l.bf16 %v1111_v54  ;;  %v1570_v57 = vunpack.c.h.bf16 %v1109_v40  ;;  %v1572_v58 = vunpack.c.h.bf16 %v1111_v54  ;;  %v1113_v1 = vld [vmem:[%s1440_s15 + $0x28] sm:$0xff]   ;;  %v1114_v11 = vld [vmem:[%s1440_s15 + $0x30] sm:$0xff]   ;;  %v327_v40 = vld [vmem:[#allocation4] sm:$0xff] }
  0x5c   : > { %v1582_v2 = vunpack.c.h.bf16 %v1112_v0  ;;  %v1584_v3 = vunpack.c.h.bf16 %v1110_v45  ;;  %v1586_v4 = vunpack.c.l.bf16 %v1113_v1  ;;  %v1595_v12 = vunpack.c.l.bf16 %v1114_v11  ;;  %v1629_v30 = vld [vmem:[#allocation2 + $0x8] sm:$0xff]  ;;  %v333_v54 = vld [vmem:[#allocation4 + $0x30] sm:$0xff] }
  0x5d   : > { %v1610_v23 = vunpack.c.h.bf16 %v1113_v1 }
  0x60   : > { %353 = vperm.xlu1 %1178, %v314_v13   ;;  %347 = vperm.xlu0 %1177, %v312_v14   ;;  %v1597_v13 = vunpack.c.l.bf16 %v1112_v0  ;;  %v1599_v14 = vunpack.c.h.bf16 %v1114_v11 }
  0x61   : > { %359 = vperm.xlu2 %1179, %v316_v15  }
  0x68   : > { %365 = vperm.xlu1 %1178, %v318_v19   ;;  %362 = vperm.xlu0 %1177, %v317_v20  }
  0x69   : > { %368 = vperm.xlu2 %1179, %v319_v21   ;;  %v1115_v21 = vld [vmem:[%s1440_s15 + $0x38] sm:$0xff]  }
  0x6a   : > { %v1608_v22 = vunpack.c.h.bf16 %v1115_v21  ;;  %v1617_v28 = vunpack.c.l.bf16 %v1115_v21 }
  0x70   : > { %374 = vperm.xlu1 %1178, %v321_v25   ;;  %371 = vperm.xlu0 %1177, %v320_v26  }
  0x71   : > { %377 = vperm.xlu2 %1179, %v322_v27  }
  0x78   : > { %383 = vperm.xlu1 %1178, %v324_v31   ;;  %380 = vperm.xlu0 %1177, %v323_v32   ;;  %v1631_v31 = vld [vmem:[#allocation2] sm:$0xff] }
  0x79   : > { %386 = vperm.xlu2 %1179, %v325_v33  }
  0x80   : > { %389 = vperm.xlu0 %1177, %v326_v35  }
  0xa2   : > { %506 = vmax.xlane.f32.xlu2 %v1545_v37  ;;  %504 = vmax.xlane.f32.xlu1 %v1547_v38 }
  0xb3   : > { %v357_v48 = vpop.permute.xlu2 %356 }
  0xb4   : > { %vm395_vm3 = vcmp.eq.s32.totalorder %v1552_v41, %v357_v48  ;;  %v331_v48 = vld [vmem:[#allocation4 + $0x20] sm:$0xff] }
  0xb5   : > { %v411_v52 = vsel %vm395_vm3, %v1561_v49, 0.0 }
  0xbb   : > { %v360_v55 = vpop.permute.xlu2 %359 }
  0xbc   : > { %vm396_vm8 = vcmp.eq.s32.totalorder %v1552_v41, %v360_v55  ;;  %v330_v55 = vld [vmem:[#allocation4 + $0x18] sm:$0xff] }
  0xbd   : > { %v412_v9 = vsel %vm396_vm8, %v1584_v3, 0.0 }
  0xc3   : > { %v369_v5 = vpop.permute.xlu2 %368 }
  0xc4   : > { %vm399_vm11 = vcmp.eq.s32.totalorder %v1552_v41, %v369_v5  ;;  %v336_v5 = vld [vmem:[#allocation4 + $0x48] sm:$0xff] }
  0xc5   : > { %v415_v19 = vsel %vm399_vm11, %v1597_v13, 0.0 }
  0xca   : > { %v351_v43 = vpop.permute.xlu1 %350  ;;  %v345_v44 = vpop.permute.xlu0 %344 }
  0xcb   : > { %vm393_vm1 = vcmp.eq.s32.totalorder %v1552_v41, %v351_v43  ;;  %vm391_vm2 = vcmp.eq.s32.totalorder %v1552_v41, %v345_v44  ;;  %v378_v17 = vpop.permute.xlu2 %377 }
  0xcc   : > { %v407_v46 = vsel %vm391_vm2, %v1547_v38, 0.0  ;;  %v409_v47 = vsel %vm393_vm1, %v1554_v42, 0.0  ;;  %vm402_vm14 = vcmp.eq.s32.totalorder %v1552_v41, %v378_v17  ;;  %vm471_vm1 = vcmask 7168   ;;  %v339_v17 = vld [vmem:[#allocation4 + $0x60] sm:$0xff] }
  0xcd   : > { %423 = vadd.xlane.f32.xlu1 %v407_v46  ;;  %427 = vadd.xlane.f32.xlu0 %v409_v47  ;;  %v418_v26 = vsel %vm402_vm14, %v1610_v23, 0.0  ;;  %v328_v47 = vld [vmem:[#allocation4 + $0x8] sm:$0xff] }
  0xd2   : > { %v354_v50 = vpop.permute.xlu1 %353  ;;  %v348_v51 = vpop.permute.xlu0 %347 }
  0xd3   : > { %vm392_vm4 = vcmp.eq.s32.totalorder %v1552_v41, %v348_v51  ;;  %vm394_vm5 = vcmp.eq.s32.totalorder %v1552_v41, %v354_v50  ;;  %v387_v27 = vpop.permute.xlu2 %386 }
  0xd4   : > { %v408_v53 = vsel %vm392_vm4, %v1545_v37, 0.0  ;;  %v410_v62 = vsel %vm394_vm5, %v1570_v57, 0.0  ;;  %vm405_vm0 = vcmp.eq.s32.totalorder %v1552_v41, %v387_v27 }
  0xd5   : > { %425 = vadd.xlane.f32.xlu2 %v408_v53  ;;  %431 = vadd.xlane.f32.xlu1 %v411_v52  ;;  %v421_v29 = vsel %vm405_vm0, %v1617_v28, 0.0 }
  0xda   : > { %v366_v59 = vpop.permute.xlu1 %365  ;;  %v363_v60 = vpop.permute.xlu0 %362 }
  0xdb   : > { %vm398_vm6 = vcmp.eq.s32.totalorder %v1552_v41, %v366_v59  ;;  %vm397_vm7 = vcmp.eq.s32.totalorder %v1552_v41, %v363_v60  ;;  %v334_v59 = vld [vmem:[#allocation4 + $0x38] sm:$0xff] }
  0xdc   : > { %v413_v61 = vsel %vm397_vm7, %v1568_v56, 0.0  ;;  %v414_v63 = vsel %vm398_vm6, %v1572_v58, 0.0 }
  0xdd   : > { %435 = vadd.xlane.f32.xlu0 %v413_v61  ;;  %429 = vadd.xlane.f32.xlu2 %v410_v62 }
  0xde   : > { %437 = vadd.xlane.f32.xlu1 %v414_v63 }
  0xe2   : > { %v375_v6 = vpop.permute.xlu1 %374  ;;  %v372_v7 = vpop.permute.xlu0 %371 }
  0xe3   : > { %vm401_vm9 = vcmp.eq.s32.totalorder %v1552_v41, %v375_v6  ;;  %vm400_vm10 = vcmp.eq.s32.totalorder %v1552_v41, %v372_v7  ;;  %v332_v6 = vld [vmem:[#allocation4 + $0x28] sm:$0xff]  ;;  %v337_v7 = vld [vmem:[#allocation4 + $0x50] sm:$0xff] }
  0xe4   : > { %v416_v8 = vsel %vm400_vm10, %v1582_v2, 0.0  ;;  %v417_v10 = vsel %vm401_vm9, %v1586_v4, 0.0 }
  0xe5   : > { %441 = vadd.xlane.f32.xlu0 %v416_v8  ;;  %433 = vadd.xlane.f32.xlu2 %v412_v9 }
  0xe6   : > { %443 = vadd.xlane.f32.xlu1 %v417_v10 }
  0xea   : > { %v384_v15 = vpop.permute.xlu1 %383  ;;  %v381_v16 = vpop.permute.xlu0 %380 }
  0xeb   : > { %vm404_vm12 = vcmp.eq.s32.totalorder %v1552_v41, %v384_v15  ;;  %vm403_vm13 = vcmp.eq.s32.totalorder %v1552_v41, %v381_v16 }
  0xec   : > { %v419_v18 = vsel %vm403_vm13, %v1595_v12, 0.0  ;;  %v420_v20 = vsel %vm404_vm12, %v1599_v14, 0.0 }
  0xed   : > { %447 = vadd.xlane.f32.xlu0 %v419_v18  ;;  %439 = vadd.xlane.f32.xlu2 %v415_v19  ;;  %v335_v18 = vld [vmem:[#allocation4 + $0x40] sm:$0xff]  ;;  %v340_v19 = vld [vmem:[#allocation4 + $0x68] sm:$0xff] }
  0xee   : > { %449 = vadd.xlane.f32.xlu1 %v420_v20 }
  0xf2   : > { %v390_v24 = vpop.permute.xlu0 %389 }
  0xf3   : > { %vm406_vm15 = vcmp.eq.s32.totalorder %v1552_v41, %v390_v24  ;;  %v329_v41 = vld [vmem:[#allocation4 + $0x10] sm:$0xff] }
  0xf4   : > { %v422_v25 = vsel %vm406_vm15, %v1608_v22, 0.0 }
  0xf5   : > { %453 = vadd.xlane.f32.xlu0 %v422_v25  ;;  %445 = vadd.xlane.f32.xlu2 %v418_v26 }
  0xf6   : > { %510 = vmax.xlane.f32.xlu1 %v1570_v57 }
  0xfd   : > { %508 = vmax.xlane.f32.xlu0 %v1554_v42  ;;  %451 = vadd.xlane.f32.xlu2 %v421_v29  ;;  %v342_v29 = vld [vmem:[#allocation4 + $0x78] sm:$0xff] }
  0xfe   : > { %516 = vmax.xlane.f32.xlu1 %v1568_v56 }
 0x105   : > { %514 = vmax.xlane.f32.xlu0 %v1584_v3  ;;  %512 = vmax.xlane.f32.xlu2 %v1561_v49 }
 0x106   : > { %522 = vmax.xlane.f32.xlu1 %v1582_v2 }
 0x10d   : > { %520 = vmax.xlane.f32.xlu0 %v1597_v13  ;;  %518 = vmax.xlane.f32.xlu2 %v1572_v58 }
 0x10e   : > { %528 = vmax.xlane.f32.xlu1 %v1595_v12 }
 0x115   : > { %526 = vmax.xlane.f32.xlu0 %v1610_v23  ;;  %524 = vmax.xlane.f32.xlu2 %v1586_v4  ;;  %v507_v32 = vpop.xlane.xlu2 %506  ;;  %v505_v33 = vpop.xlane.xlu1 %504 }
 0x116   : > { %534 = vmax.xlane.f32.xlu1 %v1608_v22  ;;  %v1637_v34 = vmax.f32 %v1629_v30, %v507_v32  ;;  %v1640_v35 = vmax.f32 %v1631_v31, %v505_v33  ;;  %v338_v32 = vld [vmem:[#allocation4 + $0x58] sm:$0xff] }
 0x117   : > { %v1667_v33 = vld [vmem:[#allocation2 + $0x18] sm:$0xff] }
 0x118   : > { %v569_v36 = vsub.f32 %v1629_v30, %v1637_v34  ;;  %825 = vst.msk [vmem:[#allocation2 + $0x8] sm:$0xff] %vm471_vm1, %v1637_v34  ;;  %v568_v39 = vsub.f32 %v1631_v31, %v1640_v35 }
 0x119   : > { %824 = vst.msk [vmem:[#allocation2] sm:$0xff] %vm471_vm1, %v1640_v35 }
 0x11d   : > { %532 = vmax.xlane.f32.xlu0 %v1617_v28  ;;  %530 = vmax.xlane.f32.xlu2 %v1599_v14 }
 0x131   : > { %639 = vperm.xlu0 %1177, %v1637_v34  }
 0x135   : > { %634 = vperm.xlu2 %1179, %v1640_v35  }
 0x140   : > { %v424_v43 = vpop.xlane.xlu1 %423  ;;  %v428_v44 = vpop.xlane.xlu0 %427 }
 0x141   : > { %v455_v45 = vadd.f32 %v424_v43, %v327_v40  ;;  %v457_v46 = vadd.f32 %v428_v44, %v329_v41 }
 0x143   : > { %472 = vst.msk [vmem:[#allocation4] sm:$0xff] %vm471_vm1, %v455_v45 }
 0x144   : > { %474 = vst.msk [vmem:[#allocation4 + $0x10] sm:$0xff] %vm471_vm1, %v457_v46 }
 0x148   : > { %v426_v50 = vpop.xlane.xlu2 %425  ;;  %v432_v51 = vpop.xlane.xlu1 %431 }
 0x149   : > { %v456_v52 = vadd.f32 %v426_v50, %v328_v47  ;;  %v459_v53 = vadd.f32 %v432_v51, %v331_v48  ;;  %v1679_v48 = vld [vmem:[#allocation2 + $0x10] sm:$0xff] }
 0x14a   : > { %v341_v50 = vld [vmem:[#allocation4 + $0x70] sm:$0xff] }
 0x14b   : > { %473 = vst.msk [vmem:[#allocation4 + $0x8] sm:$0xff] %vm471_vm1, %v456_v52  ;;  %v1681_v51 = vld [vmem:[#allocation2 + $0x30] sm:$0xff] }
 0x14c   : > { %476 = vst.msk [vmem:[#allocation4 + $0x20] sm:$0xff] %vm471_vm1, %v459_v53 }
 0x150   : > { %v436_v60 = vpop.xlane.xlu0 %435  ;;  %v430_v61 = vpop.xlane.xlu2 %429 }
 0x151   : > { %v461_v62 = vadd.f32 %v436_v60, %v333_v54  ;;  %v458_v63 = vadd.f32 %v430_v61, %v330_v55  ;;  %v438_v0 = vpop.xlane.xlu1 %437 }
 0x152   : > { %v462_v1 = vadd.f32 %v438_v0, %v334_v59  ;;  %v1702_v0 = vld [vmem:[#allocation2 + $0x20] sm:$0xff] }
 0x153   : > { %478 = vst.msk [vmem:[#allocation4 + $0x30] sm:$0xff] %vm471_vm1, %v461_v62 }
 0x154   : > { %475 = vst.msk [vmem:[#allocation4 + $0x18] sm:$0xff] %vm471_vm1, %v458_v63  ;;  %v1700_v63 = vld [vmem:[#allocation2 + $0x28] sm:$0xff] }
 0x155   : > { %479 = vst.msk [vmem:[#allocation4 + $0x38] sm:$0xff] %vm471_vm1, %v462_v1  ;;  %v1704_v1 = vld [vmem:[#allocation2 + $0x48] sm:$0xff] }
 0x158   : > { %v442_v8 = vpop.xlane.xlu0 %441  ;;  %v434_v9 = vpop.xlane.xlu2 %433 }
 0x159   : > { %v464_v10 = vadd.f32 %v442_v8, %v336_v5  ;;  %v460_v11 = vadd.f32 %v434_v9, %v332_v6  ;;  %v444_v15 = vpop.xlane.xlu1 %443 }
 0x15a   : > { %v465_v16 = vadd.f32 %v444_v15, %v337_v7 }
 0x15b   : > { %481 = vst.msk [vmem:[#allocation4 + $0x48] sm:$0xff] %vm471_vm1, %v464_v10 }
 0x15c   : > { %477 = vst.msk [vmem:[#allocation4 + $0x28] sm:$0xff] %vm471_vm1, %v460_v11 }
 0x15d   : > { %482 = vst.msk [vmem:[#allocation4 + $0x50] sm:$0xff] %vm471_vm1, %v465_v16 }
 0x160   : > { %v448_v20 = vpop.xlane.xlu0 %447  ;;  %v440_v21 = vpop.xlane.xlu2 %439 }
 0x161   : > { %v467_v24 = vadd.f32 %v448_v20, %v339_v17  ;;  %v463_v25 = vadd.f32 %v440_v21, %v335_v18  ;;  %v450_v26 = vpop.xlane.xlu1 %449  ;;  %v1730_v17 = vld [vmem:[#allocation2 + $0x40] sm:$0xff]  ;;  %v1732_v18 = vld [vmem:[#allocation2 + $0x38] sm:$0xff] }
 0x162   : > { %v468_v27 = vadd.f32 %v450_v26, %v340_v19  ;;  %v1734_v19 = vld [vmem:[#allocation2 + $0x60] sm:$0xff] }
 0x163   : > { %484 = vst.msk [vmem:[#allocation4 + $0x60] sm:$0xff] %vm471_vm1, %v467_v24 }
 0x164   : > { %480 = vst.msk [vmem:[#allocation4 + $0x40] sm:$0xff] %vm471_vm1, %v463_v25 }
 0x165   : > { %485 = vst.msk [vmem:[#allocation4 + $0x68] sm:$0xff] %vm471_vm1, %v468_v27 }
 0x168   : > { %v454_v40 = vpop.xlane.xlu0 %453  ;;  %v446_v41 = vpop.xlane.xlu2 %445 }
 0x169   : > { %v470_v43 = vadd.f32 %v454_v40, %v342_v29  ;;  %v466_v44 = vadd.f32 %v446_v41, %v338_v32  ;;  %v511_v45 = vpop.xlane.xlu1 %510  ;;  %v1760_v41 = vld [vmem:[#allocation2 + $0x58] sm:$0xff] }
 0x16a   : > { %v1670_v46 = vmax.f32 %v1667_v33, %v511_v45 }
 0x16b   : > { %487 = vst.msk [vmem:[#allocation4 + $0x78] sm:$0xff] %vm471_vm1, %v470_v43  ;;  %v1762_v43 = vld [vmem:[#allocation2 + $0x50] sm:$0xff] }
 0x16c   : > { %483 = vst.msk [vmem:[#allocation4 + $0x58] sm:$0xff] %vm471_vm1, %v466_v44  ;;  %649 = vperm.xlu0 %1177, %v1670_v46   ;;  %v1764_v44 = vld [vmem:[#allocation2 + $0x78] sm:$0xff] }
 0x16d   : > { %827 = vst.msk [vmem:[#allocation2 + $0x18] sm:$0xff] %vm471_vm1, %v1670_v46 }
 0x170   : > { %v509_v52 = vpop.xlane.xlu0 %508  ;;  %v452_v53 = vpop.xlane.xlu2 %451 }
 0x171   : > { %v1684_v54 = vmax.f32 %v1679_v48, %v509_v52  ;;  %v469_v55 = vadd.f32 %v452_v53, %v341_v50  ;;  %v517_v59 = vpop.xlane.xlu1 %516 }
 0x172   : > { %v1687_v60 = vmax.f32 %v1681_v51, %v517_v59 }
 0x173   : > { %826 = vst.msk [vmem:[#allocation2 + $0x10] sm:$0xff] %vm471_vm1, %v1684_v54  ;;  %644 = vperm.xlu1 %1178, %v1684_v54  }
 0x174   : > { %486 = vst.msk [vmem:[#allocation4 + $0x70] sm:$0xff] %vm471_vm1, %v469_v55  ;;  %664 = vperm.xlu0 %1177, %v1687_v60  }
 0x175   : > { %830 = vst.msk [vmem:[#allocation2 + $0x30] sm:$0xff] %vm471_vm1, %v1687_v60 }
 0x178   : > { %v515_v5 = vpop.xlane.xlu0 %514  ;;  %v513_v6 = vpop.xlane.xlu2 %512 }
 0x179   : > { %v1707_v7 = vmax.f32 %v1700_v63, %v515_v5  ;;  %v1710_v8 = vmax.f32 %v1702_v0, %v513_v6  ;;  %v523_v9 = vpop.xlane.xlu1 %522 }
 0x17a   : > { %v1713_v10 = vmax.f32 %v1704_v1, %v523_v9 }
 0x17b   : > { %829 = vst.msk [vmem:[#allocation2 + $0x28] sm:$0xff] %vm471_vm1, %v1707_v7  ;;  %654 = vperm.xlu2 %1179, %v1710_v8   ;;  %659 = vperm.xlu1 %1178, %v1707_v7   ;;  %v1978_v30 = vsub.f32 %v1702_v0, %v1710_v8 }
 0x17c   : > { %828 = vst.msk [vmem:[#allocation2 + $0x20] sm:$0xff] %vm471_vm1, %v1710_v8  ;;  %679 = vperm.xlu0 %1177, %v1713_v10  }
 0x17d   : > { %833 = vst.msk [vmem:[#allocation2 + $0x48] sm:$0xff] %vm471_vm1, %v1713_v10  ;;  %v592_v31 = vmul.f32 1.442695, %v1978_v30 }
 0x180   : > { %v521_v20 = vpop.xlane.xlu0 %520  ;;  %v519_v21 = vpop.xlane.xlu2 %518 }
 0x181   : > { %v1737_v24 = vmax.f32 %v1730_v17, %v521_v20  ;;  %v1740_v25 = vmax.f32 %v1732_v18, %v519_v21  ;;  %v529_v26 = vpop.xlane.xlu1 %528  ;;  %v1790_v20 = vld [vmem:[#allocation2 + $0x70] sm:$0xff]  ;;  %v1792_v21 = vld [vmem:[#allocation2 + $0x68] sm:$0xff] }
 0x182   : > { %v1743_v27 = vmax.f32 %v1734_v19, %v529_v26 }
 0x183   : > { %832 = vst.msk [vmem:[#allocation2 + $0x40] sm:$0xff] %vm471_vm1, %v1737_v24  ;;  %669 = vperm.xlu2 %1179, %v1740_v25   ;;  %674 = vperm.xlu1 %1178, %v1737_v24   ;;  %v1979_v34 = vsub.f32 %v1732_v18, %v1740_v25 }
 0x184   : > { %831 = vst.msk [vmem:[#allocation2 + $0x38] sm:$0xff] %vm471_vm1, %v1740_v25  ;;  %694 = vperm.xlu0 %1177, %v1743_v27  }
 0x185   : > { %836 = vst.msk [vmem:[#allocation2 + $0x60] sm:$0xff] %vm471_vm1, %v1743_v27  ;;  %v598_v35 = vmul.f32 1.442695, %v1979_v34 }
 0x188   : > { %v527_v45 = vpop.xlane.xlu0 %526  ;;  %v525_v50 = vpop.xlane.xlu2 %524 }
 0x189   : > { %v1767_v52 = vmax.f32 %v1760_v41, %v527_v45  ;;  %v1770_v53 = vmax.f32 %v1762_v43, %v525_v50  ;;  %v535_v55 = vpop.xlane.xlu1 %534 }
 0x18a   : > { %v1773_v59 = vmax.f32 %v1764_v44, %v535_v55 }
 0x18b   : > { %835 = vst.msk [vmem:[#allocation2 + $0x58] sm:$0xff] %vm471_vm1, %v1767_v52  ;;  %684 = vperm.xlu2 %1179, %v1770_v53   ;;  %689 = vperm.xlu1 %1178, %v1767_v52   ;;  %v1981_v0 = vsub.f32 %v1762_v43, %v1770_v53 }
 0x18c   : > { %834 = vst.msk [vmem:[#allocation2 + $0x50] sm:$0xff] %vm471_vm1, %v1770_v53  ;;  %709 = vperm.xlu0 %1177, %v1773_v59  }
 0x18d   : > { %839 = vst.msk [vmem:[#allocation2 + $0x78] sm:$0xff] %vm471_vm1, %v1773_v59  ;;  %v604_v8 = vmul.f32 1.442695, %v1981_v0  ;;  %v1990_v0 = vsub.f32 %v1760_v41, %v1767_v52 }
 0x190   : > { %v533_v26 = vpop.xlane.xlu0 %532  ;;  %v531_v45 = vpop.xlane.xlu2 %530 }
 0x191   : > { %v1795_v50 = vmax.f32 %v1790_v20, %v533_v26  ;;  %v1798_v55 = vmax.f32 %v1792_v21, %v531_v45 }
 0x193   : > { %838 = vst.msk [vmem:[#allocation2 + $0x70] sm:$0xff] %vm471_vm1, %v1795_v50  ;;  %699 = vperm.xlu2 %1179, %v1798_v55   ;;  %704 = vperm.xlu1 %1178, %v1795_v50   ;;  %v1991_v41 = vsub.f32 %v1790_v20, %v1795_v50  ;;  %v566_v50 = vld [vmem:[#allocation3 + $0x70] sm:$0xff] }
 0x194   : > { %837 = vst.msk [vmem:[#allocation2 + $0x68] sm:$0xff] %vm471_vm1, %v1798_v55 }
 0x195   : > { %v612_v52 = vmul.f32 1.442695, %v1991_v41 }
 0x198   : > { %v635_v26 = vpop.permute.xlu2 %634 }
 0x199   : > { %v712_v45 = vsub.f32 %v1547_v38, %v635_v26 }
 0x19b   : > { %v728_v5 = vmul.f32 1.442695, %v712_v45 }
 0x19d   : > { %1180 = vpow2.f32 %v728_v5 }
 0x1a3   : > { %v640_v29 = vpop.permute.xlu0 %639  ;;  %v1181_v16 = vpop.eup %1180 }
 0x1a4   : > { %v713_v40 = vsub.f32 %v1545_v37, %v640_v29 }
 0x1a6   : > { %v730_v11 = vmul.f32 1.442695, %v713_v40 }
 0x1a8   : > { %1182 = vpow2.f32 %v730_v11 }
 0x1ae   : > { %v1183_v61 = vpop.eup %1182 }
 0x1bc   : > { %760 = vadd.xlane.f32.xlu2 %v1181_v16 }
 0x1bd   : > { %762 = vadd.xlane.f32.xlu1 %v1183_v61 }
 0x1d5   : > { %v655_v9 = vpop.permute.xlu2 %654 }
 0x1d6   : > { %v716_v62 = vsub.f32 %v1561_v49, %v655_v9 }
 0x1d8   : > { %v736_v6 = vmul.f32 1.442695, %v716_v62 }
 0x1da   : > { %1184 = vpow2.f32 %v736_v6 }
 0x1dd   : > { %v670_v47 = vpop.permute.xlu2 %669 }
 0x1de   : > { %v719_v32 = vsub.f32 %v1572_v58, %v670_v47  ;;  %v650_v15 = vpop.permute.xlu0 %649 }
 0x1df   : > { %v715_v38 = vsub.f32 %v1570_v57, %v650_v15 }
 0x1e0   : > { %v1185_v37 = vpop.eup %1184  ;;  %v742_v29 = vmul.f32 1.442695, %v719_v32 }
 0x1e1   : > { %v734_v40 = vmul.f32 1.442695, %v715_v38  ;;  %768 = vadd.xlane.f32.xlu1 %v1185_v37 }
 0x1e2   : > { %1186 = vpow2.f32 %v742_v29 }
 0x1e3   : > { %1188 = vpow2.f32 %v734_v40 }
 0x1e5   : > { %v685_v11 = vpop.permute.xlu2 %684  ;;  %v645_v16 = vpop.permute.xlu1 %644 }
 0x1e6   : > { %v722_v61 = vsub.f32 %v1586_v4, %v685_v11  ;;  %v665_v5 = vpop.permute.xlu0 %664  ;;  %v714_v49 = vsub.f32 %v1554_v42, %v645_v16 }
 0x1e7   : > { %v718_v62 = vsub.f32 %v1568_v56, %v665_v5 }
 0x1e8   : > { %v1187_v6 = vpop.eup %1186  ;;  %v748_v58 = vmul.f32 1.442695, %v722_v61  ;;  %v732_v47 = vmul.f32 1.442695, %v714_v49 }
 0x1e9   : > { %v1189_v9 = vpop.eup %1188  ;;  %v740_v57 = vmul.f32 1.442695, %v718_v62  ;;  %774 = vadd.xlane.f32.xlu1 %v1187_v6 }
 0x1ea   : > { %1190 = vpow2.f32 %v748_v58  ;;  %766 = vadd.xlane.f32.xlu2 %v1189_v9 }
 0x1eb   : > { %1192 = vpow2.f32 %v740_v57 }
 0x1ec   : > { %1194 = vpow2.f32 %v732_v47 }
 0x1ed   : > { %v700_v15 = vpop.permute.xlu2 %699  ;;  %v660_v32 = vpop.permute.xlu1 %659 }
 0x1ee   : > { %v725_v26 = vsub.f32 %v1599_v14, %v700_v15  ;;  %v680_v4 = vpop.permute.xlu0 %679  ;;  %v717_v45 = vsub.f32 %v1584_v3, %v660_v32 }
 0x1ef   : > { %v721_v42 = vsub.f32 %v1582_v2, %v680_v4 }
 0x1f0   : > { %v1191_v56 = vpop.eup %1190  ;;  %v754_v38 = vmul.f32 1.442695, %v725_v26  ;;  %v738_v37 = vmul.f32 1.442695, %v717_v45 }
 0x1f1   : > { %v1193_v29 = vpop.eup %1192  ;;  %v746_v40 = vmul.f32 1.442695, %v721_v42  ;;  %780 = vadd.xlane.f32.xlu1 %v1191_v56 }
 0x1f2   : > { %v1195_v11 = vpop.eup %1194  ;;  %1196 = vpow2.f32 %v754_v38  ;;  %772 = vadd.xlane.f32.xlu2 %v1193_v29  ;;  %v586_v38 = vmul.f32 1.442695, %v569_v36  ;;  %v1980_v36 = vsub.f32 %v1667_v33, %v1670_v46  ;;  %v1983_v33 = vsub.f32 %v1679_v48, %v1684_v54 }
 0x1f3   : > { %1198 = vpow2.f32 %v746_v40  ;;  %764 = vadd.xlane.f32.xlu0 %v1195_v11  ;;  %v553_v40 = vld [vmem:[#allocation3 + $0x8] sm:$0xff]  ;;  %v1985_v48 = vsub.f32 %v1704_v1, %v1713_v10 }
 0x1f4   : > { %1200 = vpow2.f32 %v738_v37  ;;  %v588_v46 = vmul.f32 1.442695, %v1983_v33  ;;  %v560_v33 = vld [vmem:[#allocation3 + $0x40] sm:$0xff] }
 0x1f5   : > { %v675_v16 = vpop.permute.xlu1 %674  ;;  %v602_v54 = vmul.f32 1.442695, %v1985_v48 }
 0x1f6   : > { %v695_v61 = vpop.permute.xlu0 %694  ;;  %v720_v14 = vsub.f32 %v1597_v13, %v675_v16 }
 0x1f7   : > { %v724_v3 = vsub.f32 %v1595_v12, %v695_v61 }
 0x1f8   : > { %v1197_v5 = vpop.eup %1196  ;;  %v744_v2 = vmul.f32 1.442695, %v720_v14 }
 0x1f9   : > { %v1199_v49 = vpop.eup %1198  ;;  %v752_v62 = vmul.f32 1.442695, %v724_v3  ;;  %786 = vadd.xlane.f32.xlu1 %v1197_v5 }
 0x1fa   : > { %v1201_v6 = vpop.eup %1200  ;;  %1202 = vpow2.f32 %v744_v2  ;;  %778 = vadd.xlane.f32.xlu2 %v1199_v49  ;;  %v556_v49 = vld [vmem:[#allocation3 + $0x20] sm:$0xff] }
 0x1fb   : > { %1204 = vpow2.f32 %v752_v62  ;;  %770 = vadd.xlane.f32.xlu0 %v1201_v6 }
 0x1fd   : > { %v690_v58 = vpop.permute.xlu1 %689 }
 0x1fe   : > { %v710_v47 = vpop.permute.xlu0 %709  ;;  %v723_v9 = vsub.f32 %v1610_v23, %v690_v58 }
 0x1ff   : > { %v727_v57 = vsub.f32 %v1608_v22, %v710_v47  ;;  %v584_v22 = vmul.f32 1.442695, %v568_v39  ;;  %v590_v39 = vmul.f32 1.442695, %v1980_v36  ;;  %v1982_v47 = vsub.f32 %v1681_v51, %v1687_v60 }
 0x200   : > { %v1203_v15 = vpop.eup %1202  ;;  %v750_v13 = vmul.f32 1.442695, %v723_v9  ;;  %v559_v9 = vld [vmem:[#allocation3 + $0x38] sm:$0xff]  ;;  %v1984_v51 = vsub.f32 %v1792_v21, %v1798_v55  ;;  %v554_v21 = vld [vmem:[#allocation3 + $0x10] sm:$0xff] }
 0x201   : > { %v1205_v32 = vpop.eup %1204  ;;  %v758_v12 = vmul.f32 1.442695, %v727_v57  ;;  %v596_v18 = vmul.f32 1.442695, %v1982_v47 }
 0x202   : > { %1206 = vpow2.f32 %v750_v13  ;;  %784 = vadd.xlane.f32.xlu2 %v1205_v32  ;;  %v610_v60 = vmul.f32 1.442695, %v1984_v51 }
 0x203   : > { %1208 = vpow2.f32 %v758_v12  ;;  %776 = vadd.xlane.f32.xlu0 %v1203_v15  ;;  %v555_v15 = vld [vmem:[#allocation3 + $0x18] sm:$0xff] }
 0x205   : > { %v705_v26 = vpop.permute.xlu1 %704 }
 0x206   : > { %v726_v4 = vsub.f32 %v1617_v28, %v705_v26  ;;  %v552_v28 = vld [vmem:[#allocation3] sm:$0xff] }
 0x208   : > { %v1207_v45 = vpop.eup %1206  ;;  %v756_v42 = vmul.f32 1.442695, %v726_v4 }
 0x209   : > { %v1209_v56 = vpop.eup %1208 }
 0x20a   : > { %1210 = vpow2.f32 %v756_v42  ;;  %790 = vadd.xlane.f32.xlu2 %v1209_v56  ;;  %v562_v56 = vld [vmem:[#allocation3 + $0x50] sm:$0xff] }
 0x20b   : > { %782 = vadd.xlane.f32.xlu0 %v1207_v45  ;;  %1212 = vpow2.f32 %v584_v22  ;;  %v1986_v45 = vsub.f32 %v1700_v63, %v1707_v7  ;;  %v558_v22 = vld [vmem:[#allocation3 + $0x30] sm:$0xff]  ;;  %v1987_v63 = vsub.f32 %v1734_v19, %v1743_v27 }
 0x20c   : > { %1214 = vpow2.f32 %v586_v38 }
 0x20d   : > { %1216 = vpow2.f32 %v592_v31  ;;  %v594_v42 = vmul.f32 1.442695, %v1986_v45  ;;  %v608_v7 = vmul.f32 1.442695, %v1987_v63  ;;  %v561_v31 = vld [vmem:[#allocation3 + $0x48] sm:$0xff] }
 0x20e   : > { %1218 = vpow2.f32 %v598_v35  ;;  %v557_v35 = vld [vmem:[#allocation3 + $0x28] sm:$0xff] }
 0x20f   : > { %1220 = vpow2.f32 %v590_v39 }
 0x210   : > { %v1211_v23 = vpop.eup %1210  ;;  %1222 = vpow2.f32 %v604_v8  ;;  %v606_v8 = vmul.f32 1.442695, %v1990_v0 }
 0x211   : > { %v1213_v37 = vpop.eup %1212  ;;  %1224 = vpow2.f32 %v596_v18  ;;  %v564_v18 = vld [vmem:[#allocation3 + $0x60] sm:$0xff] }
 0x212   : > { %v1215_v29 = vpop.eup %1214  ;;  %v616_v11 = vmul.f32 %v1213_v37, %v552_v28  ;;  %1226 = vpow2.f32 %v588_v46 }
 0x213   : > { %788 = vadd.xlane.f32.xlu0 %v1211_v23  ;;  %v617_v61 = vmul.f32 %v1215_v29, %v553_v40  ;;  %v1217_v2 = vpop.eup %1216  ;;  %1228 = vpow2.f32 %v610_v60 }
 0x214   : > { %v620_v62 = vmul.f32 %v1217_v2, %v556_v49  ;;  %v1219_v25 = vpop.eup %1218  ;;  %1230 = vpow2.f32 %v602_v54 }
 0x215   : > { %v1221_v57 = vpop.eup %1220  ;;  %v623_v13 = vmul.f32 %v1219_v25, %v559_v9  ;;  %1232 = vpow2.f32 %v594_v42 }
 0x216   : > { %v619_v43 = vmul.f32 %v1221_v57, %v555_v15  ;;  %v1223_v4 = vpop.eup %1222  ;;  %1234 = vpow2.f32 %v608_v7 }
 0x217   : > { %v1225_v23 = vpop.eup %1224  ;;  %v626_v55 = vmul.f32 %v1223_v4, %v562_v56 }
 0x218   : > { %v1227_v38 = vpop.eup %1226  ;;  %v622_v1 = vmul.f32 %v1225_v23, %v558_v22 }
 0x219   : > { %v618_v28 = vmul.f32 %v1227_v38, %v554_v21 }
 0x22f   : > { %v761_v16 = vpop.xlane.xlu2 %760 }
 0x230   : > { %v792_v14 = vadd.f32 %v761_v16, %v616_v11  ;;  %v763_v3 = vpop.xlane.xlu1 %762 }
 0x231   : > { %v793_v5 = vadd.f32 %v763_v3, %v617_v61  ;;  %v1229_v61 = vpop.eup %1228 }
 0x232   : > { %808 = vst.msk [vmem:[#allocation3] sm:$0xff] %vm471_vm1, %v792_v14  ;;  %v1988_v14 = vsub.f32 %v1730_v17, %v1737_v24  ;;  %v1231_v30 = vpop.eup %1230  ;;  %v1989_v24 = vsub.f32 %v1764_v44, %v1773_v59 }
 0x233   : > { %809 = vst.msk [vmem:[#allocation3 + $0x8] sm:$0xff] %vm471_vm1, %v793_v5  ;;  %v565_v5 = vld [vmem:[#allocation3 + $0x68] sm:$0xff]  ;;  %v1233_v34 = vpop.eup %1232  ;;  %v625_v27 = vmul.f32 %v1231_v30, %v561_v31 }
 0x234   : > { %v600_v3 = vmul.f32 1.442695, %v1988_v14  ;;  %v629_v19 = vmul.f32 %v1229_v61, %v565_v5  ;;  %v621_v2 = vmul.f32 %v1233_v34, %v557_v35  ;;  %v1235_v47 = vpop.eup %1234 }
 0x235   : > { %v628_v46 = vmul.f32 %v1235_v47, %v564_v18 }
 0x236   : > { %1236 = vpow2.f32 %v600_v3 }
 0x23c   : > { %v1237_v25 = vpop.eup %1236 }
 0x23d   : > { %v624_v59 = vmul.f32 %v1237_v25, %v560_v33 }
 0x254   : > { %v769_v6 = vpop.xlane.xlu1 %768 }
 0x255   : > { %v796_v58 = vadd.f32 %v769_v6, %v620_v62  ;;  %v614_v6 = vmul.f32 1.442695, %v1989_v24 }
 0x257   : > { %812 = vst.msk [vmem:[#allocation3 + $0x20] sm:$0xff] %vm471_vm1, %v796_v58  ;;  %1238 = vpow2.f32 %v614_v6 }
 0x258   : > { %1240 = vpow2.f32 %v606_v8 }
 0x259   : > { %1242 = vpow2.f32 %v612_v52 }
 0x25c   : > { %v775_v53 = vpop.xlane.xlu1 %774 }
 0x25d   : > { %v767_v32 = vpop.xlane.xlu2 %766  ;;  %v799_v12 = vadd.f32 %v775_v53, %v623_v13  ;;  %v1239_v13 = vpop.eup %1238 }
 0x25e   : > { %v795_v26 = vadd.f32 %v767_v32, %v619_v43  ;;  %v567_v43 = vld [vmem:[#allocation3 + $0x78] sm:$0xff]  ;;  %v1241_v53 = vpop.eup %1240 }
 0x25f   : > { %815 = vst.msk [vmem:[#allocation3 + $0x38] sm:$0xff] %vm471_vm1, %v799_v12  ;;  %v563_v32 = vld [vmem:[#allocation3 + $0x58] sm:$0xff]  ;;  %v631_v12 = vmul.f32 %v1239_v13, %v567_v43  ;;  %v1243_v20 = vpop.eup %1242 }
 0x260   : > { %811 = vst.msk [vmem:[#allocation3 + $0x18] sm:$0xff] %vm471_vm1, %v795_v26  ;;  %v627_v60 = vmul.f32 %v1241_v53, %v563_v32  ;;  %v630_v4 = vmul.f32 %v1243_v20, %v566_v50 }
 0x264   : > { %v781_v10 = vpop.xlane.xlu1 %780 }
 0x265   : > { %v773_v37 = vpop.xlane.xlu2 %772  ;;  %v802_v29 = vadd.f32 %v781_v10, %v626_v55 }
 0x266   : > { %v798_v40 = vadd.f32 %v773_v37, %v622_v1  ;;  %v765_v11 = vpop.xlane.xlu0 %764 }
 0x267   : > { %v794_v16 = vadd.f32 %v765_v11, %v618_v28  ;;  %818 = vst.msk [vmem:[#allocation3 + $0x50] sm:$0xff] %vm471_vm1, %v802_v29 }
 0x268   : > { %814 = vst.msk [vmem:[#allocation3 + $0x30] sm:$0xff] %vm471_vm1, %v798_v40 }
 0x269   : > { %810 = vst.msk [vmem:[#allocation3 + $0x10] sm:$0xff] %vm471_vm1, %v794_v16 }
 0x26c   : > { %v787_v36 = vpop.xlane.xlu1 %786 }
 0x26d   : > { %v779_v39 = vpop.xlane.xlu2 %778  ;;  %v805_v49 = vadd.f32 %v787_v36, %v629_v19 }
 0x26e   : > { %v801_v62 = vadd.f32 %v779_v39, %v625_v27  ;;  %v771_v17 = vpop.xlane.xlu0 %770 }
 0x26f   : > { %v797_v58 = vadd.f32 %v771_v17, %v621_v2  ;;  %821 = vst.msk [vmem:[#allocation3 + $0x68] sm:$0xff] %vm471_vm1, %v805_v49 }
 0x270   : > { %817 = vst.msk [vmem:[#allocation3 + $0x48] sm:$0xff] %vm471_vm1, %v801_v62 }
 0x271   : > { %813 = vst.msk [vmem:[#allocation3 + $0x28] sm:$0xff] %vm471_vm1, %v797_v58 }
 0x275   : > { %v785_v44 = vpop.xlane.xlu2 %784 }
 0x276   : > { %v804_v9 = vadd.f32 %v785_v44, %v628_v46  ;;  %v777_v57 = vpop.xlane.xlu0 %776 }
 0x277   : > { %v800_v15 = vadd.f32 %v777_v57, %v624_v59 }
 0x278   : > { %820 = vst.msk [vmem:[#allocation3 + $0x60] sm:$0xff] %vm471_vm1, %v804_v9 }
 0x279   : > { %816 = vst.msk [vmem:[#allocation3 + $0x40] sm:$0xff] %vm471_vm1, %v800_v15 }
 0x27d   : > { %v791_v51 = vpop.xlane.xlu2 %790 }
 0x27e   : > { %v807_v26 = vadd.f32 %v791_v51, %v631_v12  ;;  %v783_v48 = vpop.xlane.xlu0 %782 }
 0x27f   : > { %v803_v54 = vadd.f32 %v783_v48, %v627_v60 }
 0x280   : > { %823 = vst.msk [vmem:[#allocation3 + $0x78] sm:$0xff] %vm471_vm1, %v807_v26 }
 0x281   : > { %819 = vst.msk [vmem:[#allocation3 + $0x58] sm:$0xff] %vm471_vm1, %v803_v54 }
 0x285   : > { %843 = sbr.rel (%p1072_p0) target bundleno = 680 (0x2a8), region = 40 }
 0x286   : > { %v789_v45 = vpop.xlane.xlu0 %788 }
 0x287   : > { %v806_v42 = vadd.f32 %v789_v45, %v630_v4 }
 0x289   : > { %822 = vst.msk [vmem:[#allocation3 + $0x70] sm:$0xff] %vm471_vm1, %v806_v42 }
 0x28a   : > { %v860_v56 = vld [vmem:[#allocation3] sm:$0xff]  ;;  %v861_v23 = vld [vmem:[#allocation3 + $0x8] sm:$0xff]  ;;  %v862_v22 = vld [vmem:[#allocation3 + $0x10] sm:$0xff] }
 0x28b   : > { %1244 = vlog2.f32 %v860_v56  ;;  %v863_v38 = vld [vmem:[#allocation3 + $0x18] sm:$0xff]  ;;  %v864_v21 = vld [vmem:[#allocation3 + $0x20] sm:$0xff]  ;;  %v865_v55 = vld [vmem:[#allocation3 + $0x28] sm:$0xff] }
 0x28c   : > { %1246 = vlog2.f32 %v861_v23  ;;  %v866_v1 = vld [vmem:[#allocation3 + $0x30] sm:$0xff]  ;;  %v844_v37 = vld [vmem:[#allocation2] sm:$0xff]  ;;  %v867_v28 = vld [vmem:[#allocation3 + $0x38] sm:$0xff] }
 0x28d   : > { %1248 = vlog2.f32 %v862_v22  ;;  %v845_v11 = vld [vmem:[#allocation2 + $0x8] sm:$0xff]  ;;  %v868_v63 = vld [vmem:[#allocation3 + $0x40] sm:$0xff]  ;;  %v846_v14 = vld [vmem:[#allocation2 + $0x10] sm:$0xff] }
 0x28e   : > { %1250 = vlog2.f32 %v863_v38  ;;  %v924_v16 = vld [vmem:[#allocation4] sm:$0xff]  ;;  %v869_v3 = vld [vmem:[#allocation3 + $0x48] sm:$0xff]  ;;  %v847_v35 = vld [vmem:[#allocation2 + $0x18] sm:$0xff] }
 0x28f   : > { %1252 = vlog2.f32 %v864_v21  ;;  %v925_v31 = vld [vmem:[#allocation4 + $0x8] sm:$0xff]  ;;  %v870_v19 = vld [vmem:[#allocation3 + $0x50] sm:$0xff]  ;;  %v848_v49 = vld [vmem:[#allocation2 + $0x20] sm:$0xff] }
 0x290   : > { %1254 = vlog2.f32 %v865_v55  ;;  %v926_v39 = vld [vmem:[#allocation4 + $0x10] sm:$0xff]  ;;  %v871_v62 = vld [vmem:[#allocation3 + $0x58] sm:$0xff]  ;;  %v849_v8 = vld [vmem:[#allocation2 + $0x28] sm:$0xff] }
 0x291   : > { %v1245_v10 = vpop.eup %1244  ;;  %1256 = vlog2.f32 %v866_v1  ;;  %v927_v58 = vld [vmem:[#allocation4 + $0x18] sm:$0xff]  ;;  %v872_v47 = vld [vmem:[#allocation3 + $0x60] sm:$0xff]  ;;  %v850_v59 = vld [vmem:[#allocation2 + $0x30] sm:$0xff] }
 0x292   : > { %v1247_v29 = vpop.eup %1246  ;;  %v877_v40 = vmul.f32 0.6931472, %v1245_v10  ;;  %1258 = vlog2.f32 %v867_v28  ;;  %v928_v46 = vld [vmem:[#allocation4 + $0x20] sm:$0xff]  ;;  %v873_v9 = vld [vmem:[#allocation3 + $0x68] sm:$0xff]  ;;  %v851_v43 = vld [vmem:[#allocation2 + $0x38] sm:$0xff] }
 0x293   : > { %v1249_v7 = vpop.eup %1248  ;;  %v879_v61 = vmul.f32 0.6931472, %v1247_v29  ;;  %1260 = vlog2.f32 %v868_v63  ;;  %v929_v52 = vld [vmem:[#allocation4 + $0x28] sm:$0xff]  ;;  %v874_v53 = vld [vmem:[#allocation3 + $0x70] sm:$0xff]  ;;  %v852_v48 = vld [vmem:[#allocation2 + $0x40] sm:$0xff] }
 0x294   : > { %v1251_v5 = vpop.eup %1250  ;;  %v908_v30 = vadd.f32 %v877_v40, %v844_v37  ;;  %v881_v34 = vmul.f32 0.6931472, %v1249_v7  ;;  %1262 = vlog2.f32 %v869_v3  ;;  %v930_v60 = vld [vmem:[#allocation4 + $0x30] sm:$0xff]  ;;  %v875_v54 = vld [vmem:[#allocation3 + $0x78] sm:$0xff]  ;;  %v853_v56 = vld [vmem:[#allocation2 + $0x48] sm:$0xff] }
 0x295   : > { %v1253_v27 = vpop.eup %1252  ;;  %v909_v36 = vadd.f32 %v879_v61, %v845_v11  ;;  %v883_v2 = vmul.f32 0.6931472, %v1251_v5  ;;  %1264 = vlog2.f32 %v870_v19  ;;  %v931_v45 = vld [vmem:[#allocation4 + $0x38] sm:$0xff]  ;;  %v932_v21 = vld [vmem:[#allocation4 + $0x40] sm:$0xff]  ;;  %v854_v1 = vld [vmem:[#allocation2 + $0x50] sm:$0xff] }
 0x296   : > { %v1255_v17 = vpop.eup %1254  ;;  %v940_v24 = vsub.f32 %v908_v30, %v924_v16  ;;  %v910_v6 = vadd.f32 %v881_v34, %v846_v14  ;;  %v885_v0 = vmul.f32 0.6931472, %v1253_v27  ;;  %1266 = vlog2.f32 %v871_v62  ;;  %v933_v29 = vld [vmem:[#allocation4 + $0x48] sm:$0xff]  ;;  %v855_v11 = vld [vmem:[#allocation2 + $0x58] sm:$0xff]  ;;  %v934_v61 = vld [vmem:[#allocation4 + $0x50] sm:$0xff] }
 0x297   : > { %v1257_v18 = vpop.eup %1256  ;;  %v941_v25 = vsub.f32 %v909_v36, %v925_v31  ;;  %v911_v33 = vadd.f32 %v883_v2, %v847_v35  ;;  %v887_v44 = vmul.f32 0.6931472, %v1255_v17  ;;  %1268 = vlog2.f32 %v872_v47  ;;  %v856_v3 = vld [vmem:[#allocation2 + $0x60] sm:$0xff]  ;;  %v935_v34 = vld [vmem:[#allocation4 + $0x58] sm:$0xff]  ;;  %v857_v19 = vld [vmem:[#allocation2 + $0x68] sm:$0xff] }
 0x298   : > { %v1259_v57 = vpop.eup %1258  ;;  %956 = vst.msk [vmem:[%s1975_s2] sm:$0xff] %vm471_vm1, %v940_v24  ;;  %v942_v15 = vsub.f32 %v910_v6, %v926_v39  ;;  %v912_v41 = vadd.f32 %v885_v0, %v848_v49  ;;  %v889_v13 = vmul.f32 0.6931472, %v1257_v18  ;;  %1270 = vlog2.f32 %v873_v9  ;;  %v936_v2 = vld [vmem:[#allocation4 + $0x60] sm:$0xff]  ;;  %v858_v62 = vld [vmem:[#allocation2 + $0x70] sm:$0xff] }
 0x299   : > { %v1261_v32 = vpop.eup %1260  ;;  %957 = vst.msk [vmem:[%s1975_s2 + $0x8] sm:$0xff] %vm471_vm1, %v941_v25  ;;  %v943_v12 = vsub.f32 %v911_v33, %v927_v58  ;;  %v913_v51 = vadd.f32 %v887_v44, %v849_v8  ;;  %v891_v26 = vmul.f32 0.6931472, %v1259_v57  ;;  %1272 = vlog2.f32 %v874_v53  ;;  %v937_v58 = vld [vmem:[#allocation4 + $0x68] sm:$0xff]  ;;  %v859_v8 = vld [vmem:[#allocation2 + $0x78] sm:$0xff]  ;;  %v938_v25 = vld [vmem:[#allocation4 + $0x70] sm:$0xff] }
 0x29a   : > { %v1263_v20 = vpop.eup %1262  ;;  %958 = vst.msk [vmem:[%s1975_s2 + $0x10] sm:$0xff] %vm471_vm1, %v942_v15  ;;  %v944_v50 = vsub.f32 %v912_v41, %v928_v46  ;;  %v914_v4 = vadd.f32 %v889_v13, %v850_v59  ;;  %v893_v42 = vmul.f32 0.6931472, %v1261_v32  ;;  %1274 = vlog2.f32 %v875_v54  ;;  %v939_v59 = vld [vmem:[#allocation4 + $0x78] sm:$0xff] }
 0x29b   : > { %v1265_v23 = vpop.eup %1264  ;;  %959 = vst.msk [vmem:[%s1975_s2 + $0x18] sm:$0xff] %vm471_vm1, %v943_v12  ;;  %v945_v22 = vsub.f32 %v913_v51, %v929_v52  ;;  %v915_v38 = vadd.f32 %v891_v26, %v851_v43  ;;  %v895_v55 = vmul.f32 0.6931472, %v1263_v20 }
 0x29c   : > { %v1267_v10 = vpop.eup %1266  ;;  %960 = vst.msk [vmem:[%s1975_s2 + $0x20] sm:$0xff] %vm471_vm1, %v944_v50  ;;  %v946_v37 = vsub.f32 %v914_v4, %v930_v60  ;;  %v916_v28 = vadd.f32 %v893_v42, %v852_v48  ;;  %v897_v40 = vmul.f32 0.6931472, %v1265_v23 }
 0x29d   : > { %v1269_v63 = vpop.eup %1268  ;;  %961 = vst.msk [vmem:[%s1975_s2 + $0x28] sm:$0xff] %vm471_vm1, %v945_v22  ;;  %v947_v7 = vsub.f32 %v915_v38, %v931_v45  ;;  %v917_v16 = vadd.f32 %v895_v55, %v853_v56  ;;  %v899_v14 = vmul.f32 0.6931472, %v1267_v10 }
 0x29e   : > { %v1271_v5 = vpop.eup %1270  ;;  %962 = vst.msk [vmem:[%s1975_s2 + $0x30] sm:$0xff] %vm471_vm1, %v946_v37  ;;  %v948_v30 = vsub.f32 %v916_v28, %v932_v21  ;;  %v918_v31 = vadd.f32 %v897_v40, %v854_v1  ;;  %v901_v35 = vmul.f32 0.6931472, %v1269_v63 }
 0x29f   : > { %v1273_v27 = vpop.eup %1272  ;;  %963 = vst.msk [vmem:[%s1975_s2 + $0x38] sm:$0xff] %vm471_vm1, %v947_v7  ;;  %v949_v36 = vsub.f32 %v917_v16, %v933_v29  ;;  %v919_v39 = vadd.f32 %v899_v14, %v855_v11  ;;  %v903_v49 = vmul.f32 0.6931472, %v1271_v5 }
 0x2a0   : > { %v1275_v17 = vpop.eup %1274  ;;  %964 = vst.msk [vmem:[%s1975_s2 + $0x40] sm:$0xff] %vm471_vm1, %v948_v30  ;;  %v950_v24 = vsub.f32 %v918_v31, %v934_v61  ;;  %v920_v6 = vadd.f32 %v901_v35, %v856_v3  ;;  %v905_v0 = vmul.f32 0.6931472, %v1273_v27 }
 0x2a1   : > { %965 = vst.msk [vmem:[%s1975_s2 + $0x48] sm:$0xff] %vm471_vm1, %v949_v36  ;;  %v951_v47 = vsub.f32 %v919_v39, %v935_v34  ;;  %v921_v18 = vadd.f32 %v903_v49, %v857_v19  ;;  %v907_v33 = vmul.f32 0.6931472, %v1275_v17 }
 0x2a2   : > { %966 = vst.msk [vmem:[%s1975_s2 + $0x50] sm:$0xff] %vm471_vm1, %v950_v24  ;;  %v952_v46 = vsub.f32 %v920_v6, %v936_v2  ;;  %v922_v44 = vadd.f32 %v905_v0, %v858_v62 }
 0x2a3   : > { %967 = vst.msk [vmem:[%s1975_s2 + $0x58] sm:$0xff] %vm471_vm1, %v951_v47  ;;  %v953_v9 = vsub.f32 %v921_v18, %v937_v58  ;;  %v923_v57 = vadd.f32 %v907_v33, %v859_v8 }
 0x2a4   : > { %968 = vst.msk [vmem:[%s1975_s2 + $0x60] sm:$0xff] %vm471_vm1, %v952_v46  ;;  %v954_v15 = vsub.f32 %v922_v44, %v938_v25 }
 0x2a5   : > { %969 = vst.msk [vmem:[%s1975_s2 + $0x68] sm:$0xff] %vm471_vm1, %v953_v9  ;;  %v955_v41 = vsub.f32 %v923_v57, %v939_v59 }
 0x2a6   : > { %970 = vst.msk [vmem:[%s1975_s2 + $0x70] sm:$0xff] %vm471_vm1, %v954_v15 }
 0x2a7   : > { %971 = vst.msk [vmem:[%s1975_s2 + $0x78] sm:$0xff] %vm471_vm1, %v955_v41 }
 0x2a8 PF: > { %s15_s14 = sadd.s32 1, %s1356_s14   ;;  %s1992_s9 = smov %s1340_s10 }
 0x2a9   : > { %p12_p1 = scmp.ge.s32.totalorder %s15_s14, 5   ;;  %s1993_s10 = smov %s1344_s11 }
 0x2aa   : > { %s1994_s11 = smov %s1428_s21  ;;  %s1995_s12 = smov %s1352_s13 }
 0x2ab   : > { %s1996_s13 = smov %s1998_s16  ;;  %14 = sbr.rel (!%p12_p1) target bundleno = 4 (0x4), region = 79 }
 0x2b0   :  { %994 = vsyncpa [#allocation6], 1 }
 0x2b1   :  { %996 = vsyncpa [#allocation6 + $0x1], 1 }

</bundles_post_ra>
